<compile_context>
chip_gen: v5e
topology: v5e:2x2
jax: 0.10.0
libtpu: 0.0.40
codegen_flags: <defaults>
</compile_context>

<pallas_src>
import numpy as np
import jax
import jax.numpy as jnp
from jax.experimental import pallas as pl
from jax.experimental.pallas import tpu as pltpu


# ----------------------------------------------------------------------------
# Kernels
# ----------------------------------------------------------------------------
def _cycle_kernel(cyc_ref, a1_ref, a12_ref, edge_ref,
                  w1a_ref, w1b_ref, w1c_ref, b1_ref,
                  w2_ref, b2_ref, w3_ref, b3_ref,
                  cyc_out_f32_ref, cyc_out_bf16_ref):
    f32 = jnp.float32
    bf16 = jnp.bfloat16
    edge = edge_ref[...]                                              # [Ne_p, Rp] bf16

    # gather edge(0b) -> cycle(1b) and the composed cycle(1b) -> cycle(1b)
    # pooling gather (A12 = A2 @ A1), as dense aggregation matmuls.
    g1 = jnp.dot(a1_ref[...], edge, preferred_element_type=f32)       # [TM, Rp]
    g2 = jnp.dot(a12_ref[...], edge, preferred_element_type=f32)      # [TM, Rp]

    # cycle_mlp( cat(cycle_rep, g2, g1) ) with the first layer split so no
    # concatenate / relayout is needed.
    h = (jnp.dot(cyc_ref[...], w1a_ref[...], preferred_element_type=f32)
         + jnp.dot(g2.astype(bf16), w1b_ref[...], preferred_element_type=f32)
         + jnp.dot(g1.astype(bf16), w1c_ref[...], preferred_element_type=f32)
         + b1_ref[...])
    h = jnp.maximum(h, 0.0)
    h = jnp.dot(h.astype(bf16), w2_ref[...], preferred_element_type=f32) + b2_ref[...]
    h = jnp.maximum(h, 0.0)
    out = (jnp.dot(h.astype(bf16), w3_ref[...], preferred_element_type=f32)
           + b3_ref[...])
    cyc_out_f32_ref[...] = out
    cyc_out_bf16_ref[...] = out.astype(bf16)


def _edge_kernel(edge_ref, a3_ref, cyc_out_ref,
                 v1a_ref, v1b_ref, c1_ref, v2_ref, c2_ref,
                 edge_out_ref):
    f32 = jnp.float32
    bf16 = jnp.bfloat16

    # gather cycle(1b) -> edge(0b)
    c2e = jnp.dot(a3_ref[...], cyc_out_ref[...], preferred_element_type=f32)

    # edge_mlp( cat(edge_rep, c2e) ) with split first-layer weights.
    h = (jnp.dot(edge_ref[...], v1a_ref[...], preferred_element_type=f32)
         + jnp.dot(c2e.astype(bf16), v1b_ref[...], preferred_element_type=f32)
         + c1_ref[...])
    h = jnp.maximum(h, 0.0)
    edge_out_ref[...] = (jnp.dot(h.astype(bf16), v2_ref[...],
                                 preferred_element_type=f32) + c2_ref[...])


# ----------------------------------------------------------------------------
# Wrapper
# ----------------------------------------------------------------------------
def _round_up(x, m):
    return ((x + m - 1) // m) * m


def _pad_to(x, shape):
    pads = [(0, s - d) for d, s in zip(x.shape, shape)]
    return jnp.pad(x, pads)


def _auto_row_tile(n):
    # bf16 operands pack 16 sublanes per vreg -> keep row tiles multiples of 16.
    for t in (512, 256, 128, 64, 32, 16):
        if n >= t:
            return t
    return 16


def _vmem_limit(args, out_bytes):
    total = sum(int(a.size) * a.dtype.itemsize for a in args) + out_bytes
    # generous headroom for double-buffering, clamped to a value that is safe
    # on all generations (<= 32 MiB scoped, fits v7x's 64 MiB VMEM).
    return int(min(max(4 * total, 8 * 2**20), 32 * 2**20))


def edge_cycle_forward(edge_rep, cycle_rep, A1, A2, A3, params, *, row_tile=None):
    f32 = jnp.float32
    bf16 = jnp.bfloat16

    Ne, R = edge_rep.shape
    Nc = cycle_rep.shape[0]
    H = params["W2"].shape[0]           # 2R
    Rp = _round_up(R, 128)              # lane-dense channel widths
    Hp = _round_up(H, 128)

    tmc = row_tile or _auto_row_tile(Nc)
    tme = row_tile or _auto_row_tile(Ne)
    Nc_p = _round_up(Nc, tmc)
    Ne_p = _round_up(Ne, tme)

    # Pre-compose the two cycle-direction gathers (both are linear maps for a
    # fixed graph G) so cycle row-tiles are independent: g2 = (A2 @ A1) @ edge.
    A12 = A2 @ A1

    # Pad + cast activations / aggregation matrices (small-integer entries are
    # exact in bf16).
    edge_p = _pad_to(edge_rep, (Ne_p, Rp)).astype(bf16)
    cyc_p = _pad_to(cycle_rep, (Nc_p, Rp)).astype(bf16)
    A1_p = _pad_to(A1, (Nc_p, Ne_p)).astype(bf16)
    A12_p = _pad_to(A12, (Nc_p, Ne_p)).astype(bf16)
    A3_p = _pad_to(A3, (Ne_p, Nc_p)).astype(bf16)

    # Split + pad weights (cyc_in column order is [cycle_rep | g2 | g1]).
    W1 = params["W1"]
    W1a = _pad_to(W1[:R], (Rp, Hp)).astype(bf16)
    W1b = _pad_to(W1[R:2 * R], (Rp, Hp)).astype(bf16)
    W1c = _pad_to(W1[2 * R:], (Rp, Hp)).astype(bf16)
    b1p = _pad_to(params["b1"].reshape(1, -1), (1, Hp)).astype(f32)
    W2p = _pad_to(params["W2"], (Hp, Hp)).astype(bf16)
    b2p = _pad_to(params["b2"].reshape(1, -1), (1, Hp)).astype(f32)
    W3p = _pad_to(params["W3"], (Hp, Rp)).astype(bf16)
    b3p = _pad_to(params["b3"].reshape(1, -1), (1, Rp)).astype(f32)
    V1 = params["V1"]
    V1a = _pad_to(V1[:R], (Rp, Hp)).astype(bf16)
    V1b = _pad_to(V1[R:], (Rp, Hp)).astype(bf16)
    c1p = _pad_to(params["c1"].reshape(1, -1), (1, Hp)).astype(f32)
    V2p = _pad_to(params["V2"], (Hp, Rp)).astype(bf16)
    c2p = _pad_to(params["c2"].reshape(1, -1), (1, Rp)).astype(f32)

    def row(tm, d):
        return pl.BlockSpec((tm, d), lambda i: (i, 0))

    def full(shape):
        return pl.BlockSpec(shape, lambda i: (0, 0))

    # ---------------- Phase 1: cycle MLP -------------------------------------
    cyc_args = (cyc_p, A1_p, A12_p, edge_p,
                W1a, W1b, W1c, b1p, W2p, b2p, W3p, b3p)
    cyc_in_specs = [
        row(tmc, Rp), row(tmc, Ne_p), row(tmc, Ne_p), full((Ne_p, Rp)),
        full((Rp, Hp)), full((Rp, Hp)), full((Rp, Hp)), full((1, Hp)),
        full((Hp, Hp)), full((1, Hp)), full((Hp, Rp)), full((1, Rp)),
    ]
    flops1 = int(2 * Nc_p * Ne_p * Rp * 2            # two gather matmuls
                 + 2 * Nc_p * Rp * Hp * 3            # split first layer
                 + 2 * Nc_p * Hp * Hp                # second layer
                 + 2 * Nc_p * Hp * Rp)               # third layer
    out_bytes1 = Nc_p * Rp * (4 + 2)                 # f32 + bf16 copies
    bytes1 = int(sum(int(a.size) * a.dtype.itemsize for a in cyc_args)
                 + out_bytes1)
    cycle_out_p, cycle_out_bf16 = pl.pallas_call(
        _cycle_kernel,
        grid=(Nc_p // tmc,),
        in_specs=cyc_in_specs,
        out_specs=(row(tmc, Rp), row(tmc, Rp)),
        out_shape=(jax.ShapeDtypeStruct((Nc_p, Rp), f32),
                   jax.ShapeDtypeStruct((Nc_p, Rp), bf16)),
        compiler_params=pltpu.CompilerParams(
            dimension_semantics=("parallel",),
            vmem_limit_bytes=_vmem_limit(cyc_args, out_bytes1)),
        cost_estimate=pl.CostEstimate(flops=flops1, transcendentals=0,
                                      bytes_accessed=bytes1),
    )(*cyc_args)

    # ---------------- Phase 2: edge MLP --------------------------------------
    edge_args = (edge_p, A3_p, cycle_out_bf16, V1a, V1b, c1p, V2p, c2p)
    edge_in_specs = [
        row(tme, Rp), row(tme, Nc_p), full((Nc_p, Rp)),
        full((Rp, Hp)), full((Rp, Hp)), full((1, Hp)),
        full((Hp, Rp)), full((1, Rp)),
    ]
    flops2 = int(2 * Ne_p * Nc_p * Rp                # gather matmul
                 + 2 * Ne_p * Rp * Hp * 2            # split first layer
                 + 2 * Ne_p * Hp * Rp)               # second layer
    out_bytes2 = Ne_p * Rp * 4
    bytes2 = int(sum(int(a.size) * a.dtype.itemsize for a in edge_args)
                 + out_bytes2)
    edge_out_p = pl.pallas_call(
        _edge_kernel,
        grid=(Ne_p // tme,),
        in_specs=edge_in_specs,
        out_specs=row(tme, Rp),
        out_shape=jax.ShapeDtypeStruct((Ne_p, Rp), f32),
        compiler_params=pltpu.CompilerParams(
            dimension_semantics=("parallel",),
            vmem_limit_bytes=_vmem_limit(edge_args, out_bytes2)),
        cost_estimate=pl.CostEstimate(flops=flops2, transcendentals=0,
                                      bytes_accessed=bytes2),
    )(*edge_args)

    return edge_out_p[:Ne, :R], cycle_out_p[:Nc, :R]


# ----------------------------------------------------------------------------
# Parameters / synthetic graph / reference
# ----------------------------------------------------------------------------
def _fold_bn(W, b, gamma, beta, mean, var, eps=1e-5):
    """Fold eval-mode BatchNorm1d into the preceding Linear."""
    s = gamma / jnp.sqrt(var + eps)
    return W * s[None, :], (b - mean) * s + beta


def make_params(rep_dim, key):
    R = rep_dim
    H = rep_dim * 2  # _inner_mlp_mult = 2
    ks = jax.random.split(key, 10)

    def lin(k, din, dout):
        kw, kb = jax.random.split(k)
        scale = 1.0 / np.sqrt(din)
        W = jax.random.uniform(kw, (din, dout), jnp.float32, -scale, scale)
        b = jax.random.uniform(kb, (dout,), jnp.float32, -scale, scale)
        return W, b

    def bn_defaults(d):
        return (jnp.ones((d,), jnp.float32), jnp.zeros((d,), jnp.float32),
                jnp.zeros((d,), jnp.float32), jnp.ones((d,), jnp.float32))

    # cycle_mlp: 3R -> 2R -> 2R -> R
    W1, b1 = lin(ks[0], 3 * R, H)
    W1, b1 = _fold_bn(W1, b1, *bn_defaults(H))
    W2, b2 = lin(ks[1], H, H)
    W2, b2 = _fold_bn(W2, b2, *bn_defaults(H))
    W3, b3 = lin(ks[2], H, R)
    # edge_mlp: 2R -> 2R -> R
    V1, c1 = lin(ks[3], 2 * R, H)
    V1, c1 = _fold_bn(V1, c1, *bn_defaults(H))
    V2, c2 = lin(ks[4], H, R)

    return {
        "W1": W1, "b1": b1[None, :], "W2": W2, "b2": b2[None, :],
        "W3": W3, "b3": b3[None, :],
        "V1": V1, "c1": c1[None, :], "V2": V2, "c2": c2[None, :],
    }


def make_gather_matrices(Ne, cycle_lens):
    """Deterministic synthetic gather/aggregation matrices for a fixed graph."""
    Nc = sum(cycle_lens)
    # edge -> cycle atoms: each cycle atom aggregates two (deterministic) edges.
    A1 = np.zeros((Nc, Ne), np.float32)
    for i in range(Nc):
        A1[i, (2 * i) % Ne] = 1.0
        A1[i, (2 * i + 1) % Ne] = 1.0
    # within-cycle pooling (block-diagonal all-ones blocks) — 1->1 gather linmap.
    A2 = np.zeros((Nc, Nc), np.float32)
    off = 0
    for L in cycle_lens:
        A2[off:off + L, off:off + L] = 1.0
        off += L
    # cycle atoms -> edges: each edge aggregates the cycle atoms it touches.
    A3 = np.zeros((Ne, Nc), np.float32)
    for j in range(Ne):
        A3[j, (3 * j) % Nc] = 1.0
        A3[j, (3 * j + 1) % Nc] = 1.0
    return jnp.asarray(A1), jnp.asarray(A2), jnp.asarray(A3)


def reference_forward(edge_rep, cycle_rep, A1, A2, A3, p):
    g1 = A1 @ edge_rep
    e2c = jnp.concatenate([A2 @ g1, g1], axis=-1)
    cyc_in = jnp.concatenate([cycle_rep, e2c], axis=-1)
    h = jnp.maximum(cyc_in @ p["W1"] + p["b1"], 0.0)
    h = jnp.maximum(h @ p["W2"] + p["b2"], 0.0)
    cycle_out = h @ p["W3"] + p["b3"]
    c2e = A3 @ cycle_out
    edge_in = jnp.concatenate([edge_rep, c2e], axis=-1)
    h2 = jnp.maximum(edge_in @ p["V1"] + p["c1"], 0.0)
    edge_out = h2 @ p["V2"] + p["c2"]
    return edge_out, cycle_out


if __name__ == "__main__":
    rep_dim = 32
    # synthetic batched-graph sizes: 2 five-cycles + 1 six-cycle, 32 edges
    cycle_lens = [5, 5, 6]
    Ne = 32
    Nc = sum(cycle_lens)          # 16 cycle atoms total

    key = jax.random.PRNGKey(0)
    k_e, k_c, k_p = jax.random.split(key, 3)
    edge_rep = jax.random.normal(k_e, (Ne, rep_dim), jnp.float32)
    cycle_rep = jax.random.normal(k_c, (Nc, rep_dim), jnp.float32)
    A1, A2, A3 = make_gather_matrices(Ne, cycle_lens)
    params = make_params(rep_dim, k_p)

    # row_tile=16 exercises a >1 grid on the edge phase at these toy sizes.
    edge_out, cycle_out = edge_cycle_forward(edge_rep, cycle_rep, A1, A2, A3,
                                             params, row_tile=16)
    jax.block_until_ready((edge_out, cycle_out))

    ref_e, ref_c = reference_forward(edge_rep, cycle_rep, A1, A2, A3, params)
    # bf16 matmul inputs (f32 accumulate) vs an all-f32 reference.
    np.testing.assert_allclose(np.asarray(cycle_out), np.asarray(ref_c),
                               rtol=5e-2, atol=5e-2)
    np.testing.assert_allclose(np.asarray(edge_out), np.asarray(ref_e),
                               rtol=5e-2, atol=5e-2)
    print("KERNEL_OK")
</pallas_src>

<mosaic_0001>
module attributes {stable_mosaic.version = 11 : i64} {
  func.func @_cycle_kernel(%arg0: i32, %arg1: memref<16x128xbf16, #tpu.memory_space<vmem>>, %arg2: memref<16x32xbf16, #tpu.memory_space<vmem>>, %arg3: memref<16x32xbf16, #tpu.memory_space<vmem>>, %arg4: memref<32x128xbf16, #tpu.memory_space<vmem>>, %arg5: memref<128x128xbf16, #tpu.memory_space<vmem>>, %arg6: memref<128x128xbf16, #tpu.memory_space<vmem>>, %arg7: memref<128x128xbf16, #tpu.memory_space<vmem>>, %arg8: memref<1x128xf32, #tpu.memory_space<vmem>>, %arg9: memref<128x128xbf16, #tpu.memory_space<vmem>>, %arg10: memref<1x128xf32, #tpu.memory_space<vmem>>, %arg11: memref<128x128xbf16, #tpu.memory_space<vmem>>, %arg12: memref<1x128xf32, #tpu.memory_space<vmem>>, %arg13: memref<16x128xf32, #tpu.memory_space<vmem>>, %arg14: memref<16x128xbf16, #tpu.memory_space<vmem>>) attributes {dimension_semantics = [#tpu.dimension_semantics<parallel>], iteration_bounds = array<i64: 1>, scalar_prefetch = 0 : i64, scratch_operands = 0 : i64, tpu.core_type = #tpu.core_type<tc>, window_params = [{transform_indices = @transform_0, window_bounds = array<i64: 16, 128>}, {transform_indices = @transform_1, window_bounds = array<i64: 16, 32>}, {transform_indices = @transform_2, window_bounds = array<i64: 16, 32>}, {pipeline_mode = #tpu.pipeline_mode<synchronous>, transform_indices = @transform_3, window_bounds = array<i64: 32, 128>}, {pipeline_mode = #tpu.pipeline_mode<synchronous>, transform_indices = @transform_4, window_bounds = array<i64: 128, 128>}, {pipeline_mode = #tpu.pipeline_mode<synchronous>, transform_indices = @transform_5, window_bounds = array<i64: 128, 128>}, {pipeline_mode = #tpu.pipeline_mode<synchronous>, transform_indices = @transform_6, window_bounds = array<i64: 128, 128>}, {pipeline_mode = #tpu.pipeline_mode<synchronous>, transform_indices = @transform_7, window_bounds = array<i64: 1, 128>}, {pipeline_mode = #tpu.pipeline_mode<synchronous>, transform_indices = @transform_8, window_bounds = array<i64: 128, 128>}, {pipeline_mode = #tpu.pipeline_mode<synchronous>, transform_indices = @transform_9, window_bounds = array<i64: 1, 128>}, {pipeline_mode = #tpu.pipeline_mode<synchronous>, transform_indices = @transform_10, window_bounds = array<i64: 128, 128>}, {pipeline_mode = #tpu.pipeline_mode<synchronous>, transform_indices = @transform_11, window_bounds = array<i64: 1, 128>}, {transform_indices = @transform_12, window_bounds = array<i64: 16, 128>}, {transform_indices = @transform_13, window_bounds = array<i64: 16, 128>}]} {
    %c0 = arith.constant 0 : index
    %c0_0 = arith.constant 0 : index
    %0 = vector.load %arg4[%c0, %c0_0] : memref<32x128xbf16, #tpu.memory_space<vmem>>, vector<32x128xbf16>
    %c0_1 = arith.constant 0 : index
    %c0_2 = arith.constant 0 : index
    %1 = vector.load %arg2[%c0_1, %c0_2] : memref<16x32xbf16, #tpu.memory_space<vmem>>, vector<16x32xbf16>
    %cst = arith.constant dense<0.000000e+00> : vector<16x128xf32>
    %2 = tpu.matmul %1, %0, %cst {dimension_numbers = #tpu.dot_dimension_numbers<[1], [0], [0], [1], [0, 0, 1, 1], [], []>} : vector<16x32xbf16>, vector<32x128xbf16>, vector<16x128xf32> -> vector<16x128xf32>
    %c0_3 = arith.constant 0 : index
    %c0_4 = arith.constant 0 : index
    %3 = vector.load %arg3[%c0_3, %c0_4] : memref<16x32xbf16, #tpu.memory_space<vmem>>, vector<16x32xbf16>
    %cst_5 = arith.constant dense<0.000000e+00> : vector<16x128xf32>
    %4 = tpu.matmul %3, %0, %cst_5 {dimension_numbers = #tpu.dot_dimension_numbers<[1], [0], [0], [1], [0, 0, 1, 1], [], []>} : vector<16x32xbf16>, vector<32x128xbf16>, vector<16x128xf32> -> vector<16x128xf32>
    %c0_6 = arith.constant 0 : index
    %c0_7 = arith.constant 0 : index
    %5 = vector.load %arg1[%c0_6, %c0_7] : memref<16x128xbf16, #tpu.memory_space<vmem>>, vector<16x128xbf16>
    %c0_8 = arith.constant 0 : index
    %c0_9 = arith.constant 0 : index
    %6 = vector.load %arg5[%c0_8, %c0_9] : memref<128x128xbf16, #tpu.memory_space<vmem>>, vector<128x128xbf16>
    %cst_10 = arith.constant dense<0.000000e+00> : vector<16x128xf32>
    %7 = tpu.matmul %5, %6, %cst_10 {dimension_numbers = #tpu.dot_dimension_numbers<[1], [0], [0], [1], [0, 0, 1, 1], [], []>} : vector<16x128xbf16>, vector<128x128xbf16>, vector<16x128xf32> -> vector<16x128xf32>
    %8 = arith.truncf %4 : vector<16x128xf32> to vector<16x128xbf16>
    %c0_11 = arith.constant 0 : index
    %c0_12 = arith.constant 0 : index
    %9 = vector.load %arg6[%c0_11, %c0_12] : memref<128x128xbf16, #tpu.memory_space<vmem>>, vector<128x128xbf16>
    %cst_13 = arith.constant dense<0.000000e+00> : vector<16x128xf32>
    %10 = tpu.matmul %8, %9, %cst_13 {dimension_numbers = #tpu.dot_dimension_numbers<[1], [0], [0], [1], [0, 0, 1, 1], [], []>} : vector<16x128xbf16>, vector<128x128xbf16>, vector<16x128xf32> -> vector<16x128xf32>
    %11 = arith.addf %7, %10 : vector<16x128xf32>
    %12 = arith.truncf %2 : vector<16x128xf32> to vector<16x128xbf16>
    %c0_14 = arith.constant 0 : index
    %c0_15 = arith.constant 0 : index
    %13 = vector.load %arg7[%c0_14, %c0_15] : memref<128x128xbf16, #tpu.memory_space<vmem>>, vector<128x128xbf16>
    %cst_16 = arith.constant dense<0.000000e+00> : vector<16x128xf32>
    %14 = tpu.matmul %12, %13, %cst_16 {dimension_numbers = #tpu.dot_dimension_numbers<[1], [0], [0], [1], [0, 0, 1, 1], [], []>} : vector<16x128xbf16>, vector<128x128xbf16>, vector<16x128xf32> -> vector<16x128xf32>
    %15 = arith.addf %11, %14 : vector<16x128xf32>
    %c0_17 = arith.constant 0 : index
    %c0_18 = arith.constant 0 : index
    %16 = vector.load %arg8[%c0_17, %c0_18] : memref<1x128xf32, #tpu.memory_space<vmem>>, vector<1x128xf32>
    %17 = vector.broadcast %16 : vector<1x128xf32> to vector<16x128xf32>
    %18 = arith.addf %15, %17 : vector<16x128xf32>
    %cst_19 = arith.constant 0.000000e+00 : f32
    %19 = vector.broadcast %cst_19 : f32 to vector<16x128xf32>
    %20 = arith.maximumf %18, %19 : vector<16x128xf32>
    %21 = arith.truncf %20 : vector<16x128xf32> to vector<16x128xbf16>
    %c0_20 = arith.constant 0 : index
    %c0_21 = arith.constant 0 : index
    %22 = vector.load %arg9[%c0_20, %c0_21] : memref<128x128xbf16, #tpu.memory_space<vmem>>, vector<128x128xbf16>
    %cst_22 = arith.constant dense<0.000000e+00> : vector<16x128xf32>
    %23 = tpu.matmul %21, %22, %cst_22 {dimension_numbers = #tpu.dot_dimension_numbers<[1], [0], [0], [1], [0, 0, 1, 1], [], []>} : vector<16x128xbf16>, vector<128x128xbf16>, vector<16x128xf32> -> vector<16x128xf32>
    %c0_23 = arith.constant 0 : index
    %c0_24 = arith.constant 0 : index
    %24 = vector.load %arg10[%c0_23, %c0_24] : memref<1x128xf32, #tpu.memory_space<vmem>>, vector<1x128xf32>
    %25 = vector.broadcast %24 : vector<1x128xf32> to vector<16x128xf32>
    %26 = arith.addf %23, %25 : vector<16x128xf32>
    %cst_25 = arith.constant 0.000000e+00 : f32
    %27 = vector.broadcast %cst_25 : f32 to vector<16x128xf32>
    %28 = arith.maximumf %26, %27 : vector<16x128xf32>
    %29 = arith.truncf %28 : vector<16x128xf32> to vector<16x128xbf16>
    %c0_26 = arith.constant 0 : index
    %c0_27 = arith.constant 0 : index
    %30 = vector.load %arg11[%c0_26, %c0_27] : memref<128x128xbf16, #tpu.memory_space<vmem>>, vector<128x128xbf16>
    %cst_28 = arith.constant dense<0.000000e+00> : vector<16x128xf32>
    %31 = tpu.matmul %29, %30, %cst_28 {dimension_numbers = #tpu.dot_dimension_numbers<[1], [0], [0], [1], [0, 0, 1, 1], [], []>} : vector<16x128xbf16>, vector<128x128xbf16>, vector<16x128xf32> -> vector<16x128xf32>
    %c0_29 = arith.constant 0 : index
    %c0_30 = arith.constant 0 : index
    %32 = vector.load %arg12[%c0_29, %c0_30] : memref<1x128xf32, #tpu.memory_space<vmem>>, vector<1x128xf32>
    %33 = vector.broadcast %32 : vector<1x128xf32> to vector<16x128xf32>
    %34 = arith.addf %31, %33 : vector<16x128xf32>
    %c0_31 = arith.constant 0 : index
    %c0_32 = arith.constant 0 : index
    %35 = vector.load %arg13[%c0_31, %c0_32] : memref<16x128xf32, #tpu.memory_space<vmem>>, vector<16x128xf32>
    tpu.vector_store %arg13[%c0_31, %c0_32], %34 {strides = array<i32>} : memref<16x128xf32, #tpu.memory_space<vmem>>, vector<16x128xf32>,
    %36 = arith.truncf %34 : vector<16x128xf32> to vector<16x128xbf16>
    %c0_33 = arith.constant 0 : index
    %c0_34 = arith.constant 0 : index
    %37 = vector.load %arg14[%c0_33, %c0_34] : memref<16x128xbf16, #tpu.memory_space<vmem>>, vector<16x128xbf16>
    tpu.vector_store %arg14[%c0_33, %c0_34], %36 {strides = array<i32>} : memref<16x128xbf16, #tpu.memory_space<vmem>>, vector<16x128xbf16>,
    return
  }
  func.func @transform_0(%arg0: i32) -> (i32, i32) {
    %c0_i32 = arith.constant 0 : i32
    %c0_i32_0 = arith.constant 0 : i32
    return %arg0, %c0_i32 : i32, i32
  }
  func.func @transform_1(%arg0: i32) -> (i32, i32) {
    %c0_i32 = arith.constant 0 : i32
    %c0_i32_0 = arith.constant 0 : i32
    return %arg0, %c0_i32 : i32, i32
  }
  func.func @transform_2(%arg0: i32) -> (i32, i32) {
    %c0_i32 = arith.constant 0 : i32
    %c0_i32_0 = arith.constant 0 : i32
    return %arg0, %c0_i32 : i32, i32
  }
  func.func @transform_3(%arg0: i32) -> (i32, i32) {
    %c0_i32 = arith.constant 0 : i32
    %c0_i32_0 = arith.constant 0 : i32
    %c0_i32_1 = arith.constant 0 : i32
    return %c0_i32, %c0_i32_0 : i32, i32
  }
  func.func @transform_4(%arg0: i32) -> (i32, i32) {
    %c0_i32 = arith.constant 0 : i32
    %c0_i32_0 = arith.constant 0 : i32
    %c0_i32_1 = arith.constant 0 : i32
    return %c0_i32, %c0_i32_0 : i32, i32
  }
  func.func @transform_5(%arg0: i32) -> (i32, i32) {
    %c0_i32 = arith.constant 0 : i32
    %c0_i32_0 = arith.constant 0 : i32
    %c0_i32_1 = arith.constant 0 : i32
    return %c0_i32, %c0_i32_0 : i32, i32
  }
  func.func @transform_6(%arg0: i32) -> (i32, i32) {
    %c0_i32 = arith.constant 0 : i32
    %c0_i32_0 = arith.constant 0 : i32
    %c0_i32_1 = arith.constant 0 : i32
    return %c0_i32, %c0_i32_0 : i32, i32
  }
  func.func @transform_7(%arg0: i32) -> (i32, i32) {
    %c0_i32 = arith.constant 0 : i32
    %c0_i32_0 = arith.constant 0 : i32
    %c0_i32_1 = arith.constant 0 : i32
    return %c0_i32, %c0_i32_0 : i32, i32
  }
  func.func @transform_8(%arg0: i32) -> (i32, i32) {
    %c0_i32 = arith.constant 0 : i32
    %c0_i32_0 = arith.constant 0 : i32
    %c0_i32_1 = arith.constant 0 : i32
    return %c0_i32, %c0_i32_0 : i32, i32
  }
  func.func @transform_9(%arg0: i32) -> (i32, i32) {
    %c0_i32 = arith.constant 0 : i32
    %c0_i32_0 = arith.constant 0 : i32
    %c0_i32_1 = arith.constant 0 : i32
    return %c0_i32, %c0_i32_0 : i32, i32
  }
  func.func @transform_10(%arg0: i32) -> (i32, i32) {
    %c0_i32 = arith.constant 0 : i32
    %c0_i32_0 = arith.constant 0 : i32
    %c0_i32_1 = arith.constant 0 : i32
    return %c0_i32, %c0_i32_0 : i32, i32
  }
  func.func @transform_11(%arg0: i32) -> (i32, i32) {
    %c0_i32 = arith.constant 0 : i32
    %c0_i32_0 = arith.constant 0 : i32
    %c0_i32_1 = arith.constant 0 : i32
    return %c0_i32, %c0_i32_0 : i32, i32
  }
  func.func @transform_12(%arg0: i32) -> (i32, i32) {
    %c0_i32 = arith.constant 0 : i32
    %c0_i32_0 = arith.constant 0 : i32
    return %arg0, %c0_i32 : i32, i32
  }
  func.func @transform_13(%arg0: i32) -> (i32, i32) {
    %c0_i32 = arith.constant 0 : i32
    %c0_i32_0 = arith.constant 0 : i32
    return %arg0, %c0_i32 : i32, i32
  }
}

</mosaic_0001>

<bundles_post_ra>
// kernel: tpu_custom_call.1
= control target key start
LH: loop header
LB: loop body
LE: loop exit
PB: predicated region body
PF: predicated region fallthrough
CT: control target
= control target key end

     0   :  { %19 = vsyncpa [#allocation3], 0  ;;  %s1405_s0 = inlined_call_operand.hbm [shape: bf16[16,128], index: 0, kind: input, shape index: {}]   ;;  %s1406_s1 = inlined_call_operand.hbm [shape: bf16[16,32], index: 1, kind: input, shape index: {}]   ;;  %s1407_s2 = inlined_call_operand.hbm [shape: bf16[16,32], index: 2, kind: input, shape index: {}]   ;;  %s1408_s3 = inlined_call_operand.hbm [shape: bf16[32,128], index: 3, kind: input, shape index: {}]   ;;  %s1409_s4 = inlined_call_operand.hbm [shape: bf16[128,128], index: 4, kind: input, shape index: {}]   ;;  %s1410_s5 = inlined_call_operand.hbm [shape: bf16[128,128], index: 5, kind: input, shape index: {}]   ;;  %s1411_s6 = inlined_call_operand.hbm [shape: bf16[128,128], index: 6, kind: input, shape index: {}]   ;;  %s1412_s7 = inlined_call_operand.vmem [shape: f32[1,128], index: 7, kind: input, shape index: {}]   ;;  %s1413_s8 = inlined_call_operand.hbm [shape: bf16[128,128], index: 8, kind: input, shape index: {}]   ;;  %s1414_s9 = inlined_call_operand.vmem [shape: f32[1,128], index: 9, kind: input, shape index: {}]   ;;  %s1415_s10 = inlined_call_operand.hbm [shape: bf16[128,128], index: 10, kind: input, shape index: {}]   ;;  %s1416_s11 = inlined_call_operand.vmem [shape: f32[1,128], index: 11, kind: input, shape index: {}]   ;;  %s1417_s12 = inlined_call_operand.hbm [shape: f32[16,128], index: 12, kind: output, shape index: {0}]   ;;  %s1418_s13 = inlined_call_operand.hbm [shape: bf16[16,128], index: 13, kind: output, shape index: {1}]  }
   0x1   :  { %20 = vsyncpa [#allocation6], 0 }
   0x2   :  { %21 = vsyncpa [#allocation9], 0 }
   0x3   :  { %22 = vsyncpa [#allocation12], 0 }
   0x4   :  { %23 = vsyncpa [#allocation15], 0 }
   0x5   :  { %24 = vsyncpa [#allocation4], 0 }
   0x6   :  { %25 = vsyncpa [#allocation19], 0  ;;  %s43_s27 = sshll.u32 %s1406_s1, 4  ;;  %s1248_s28 = smov [#allocation5]   ;;  %s44_s27 = int_to_ptr.hbm [resolvable:$true] %s43_s27 }
   0x7   :  { %s45_s29 = sshll.u32 %s1248_s28, 4  ;;  %s69_s15 = sshll.u32 %s1408_s3, 4  ;;  %s46_s29 = int_to_ptr.vmem [resolvable:$true] %s45_s29  ;;  %s70_s15 = int_to_ptr.hbm [resolvable:$true] %s69_s15 }
   0x8   :  { %s1249_s16 = smov 64   ;;  %s1250_s17 = smov 4  }
   0x9   :  { %51 = dma.hbm_to_vmem [thread:$0]  %s44_s27, 128, %s46_s29, [#allocation6], %s1249_s16, %s1249_s16, %s1250_s17  }
   0xa   :  { %s1251_s18 = smov [#allocation8]   ;;  %s95_s1 = sshll.u32 %s1410_s5, 4  ;;  %s96_s1 = int_to_ptr.hbm [resolvable:$true] %s95_s1 }
   0xb   :  { %s71_s19 = sshll.u32 %s1251_s18, 4  ;;  %s123_s23 = sshll.u32 %s1413_s8, 4  ;;  %s72_s19 = int_to_ptr.vmem [resolvable:$true] %s71_s19  ;;  %s124_s23 = int_to_ptr.hbm [resolvable:$true] %s123_s23 }
   0xc   :  { %77 = dma.hbm_to_vmem [thread:$0]  %s70_s15, 256, %s72_s19, [#allocation9], %s1249_s16, %s1249_s16, %s1250_s17  }
   0xd   :  { %s1252_s24 = smov [#allocation11]   ;;  %s1253_s26 = smov [#allocation14]  }
   0xe   :  { %s97_s25 = sshll.u32 %s1252_s24, 4  ;;  %s125_s5 = sshll.u32 %s1253_s26, 4  ;;  %s98_s25 = int_to_ptr.vmem [resolvable:$true] %s97_s25  ;;  %s126_s5 = int_to_ptr.vmem [resolvable:$true] %s125_s5 }
   0xf   :  { %103 = dma.hbm_to_vmem [thread:$0]  %s96_s1, 1024, %s98_s25, [#allocation12], %s1249_s16, %s1249_s16, %s1250_s17  }
  0x10   :  { %s30_s29 = sshll.u32 %s1405_s0, 4  ;;  %s56_s14 = sshll.u32 %s1407_s2, 4  ;;  %s31_s29 = int_to_ptr.hbm [resolvable:$true] %s30_s29  ;;  %s57_s14 = int_to_ptr.hbm [resolvable:$true] %s56_s14 }
  0x11   :  { %131 = dma.hbm_to_vmem [thread:$0]  %s124_s23, 1024, %s126_s5, [#allocation15], %s1249_s16, %s1249_s16, %s1250_s17  }
  0x12   :  { %s1254_s15 = smov [#allocation2]   ;;  %s1255_s19 = smov [#allocation7]  }
  0x13   :  { %s32_s18 = sshll.u32 %s1254_s15, 4  ;;  %s58_s0 = sshll.u32 %s1255_s19, 4  ;;  %s33_s18 = int_to_ptr.vmem [resolvable:$true] %s32_s18  ;;  %s59_s0 = int_to_ptr.vmem [resolvable:$true] %s58_s0 }
  0x14   :  { %38 = dma.hbm_to_vmem [thread:$0]  %s31_s29, 128, %s33_s18, [#allocation3], %s1249_s16, %s1249_s16, %s1250_s17  }
  0x15   :  { %s82_s1 = sshll.u32 %s1409_s4, 4  ;;  %s108_s22 = sshll.u32 %s1411_s6, 4  ;;  %s83_s1 = int_to_ptr.hbm [resolvable:$true] %s82_s1  ;;  %s109_s22 = int_to_ptr.hbm [resolvable:$true] %s108_s22 }
  0x16   :  { %64 = dma.hbm_to_vmem [thread:$0]  %s57_s14, 128, %s59_s0, [#allocation6], %s1249_s16, %s1249_s16, %s1250_s17  }
  0x17   :  { %s1256_s23 = smov [#allocation10]   ;;  %s1257_s25 = smov [#allocation13]  }
  0x18   :  { %s84_s24 = sshll.u32 %s1256_s23, 4  ;;  %s110_s4 = sshll.u32 %s1257_s25, 4  ;;  %s85_s24 = int_to_ptr.vmem [resolvable:$true] %s84_s24  ;;  %s111_s4 = int_to_ptr.vmem [resolvable:$true] %s110_s4 }
  0x19   :  { %90 = dma.hbm_to_vmem [thread:$0]  %s83_s1, 1024, %s85_s24, [#allocation9], %s1249_s16, %s1249_s16, %s1250_s17  }
  0x1a   :  { %s138_s27 = sshll.u32 %s1415_s10, 4  ;;  %s1258_s6 = smov [#allocation16]   ;;  %s139_s27 = int_to_ptr.hbm [resolvable:$true] %s138_s27 }
  0x1b   :  { %116 = dma.hbm_to_vmem [thread:$0]  %s109_s22, 1024, %s111_s4, [#allocation12], %s1249_s16, %s1249_s16, %s1250_s17  }
  0x1c   :  { %s140_s28 = sshll.u32 %s1258_s6, 4  ;;  %s141_s28 = int_to_ptr.vmem [resolvable:$true] %s140_s28 }
  0x1d   :  { %146 = dma.hbm_to_vmem [thread:$0]  %s139_s27, 1024, %s141_s28, [#allocation15], %s1249_s16, %s1249_s16, %s1250_s17  }
  0x1e   :  { %1234 = dma.done.wait [#allocation3], 128  }
  0x1f   :  { %1235 = vsyncadd [#allocation3], 4294967168 }
  0x20   :  { %1236 = dma.done.wait [#allocation6], 256  }
  0x21   :  { %1237 = vsyncadd [#allocation6], 4294967040 }
  0x22   :  { %1238 = dma.done.wait [#allocation9], 1280  }
  0x23   :  { %1239 = vsyncadd [#allocation9], 4294966016 }
  0x24   :  { %1240 = dma.done.wait [#allocation12], 2048  }
  0x25   :  { %1241 = vsyncadd [#allocation12], 4294965248 }
  0x26   :  { %1242 = dma.done.wait [#allocation15], 2048  }
  0x27   :  { %1243 = vsyncadd [#allocation15], 4294965248  ;;  %v903_v0 = vld [vmem:[#allocation8 + $0x8] sm:$0xff]  ;;  %v902_v2 = vld [vmem:[#allocation8] sm:$0xff]  ;;  %vm209_vm0 = vcmask 261120   ;;  %s1259_s15 = smov [#allocation17]  }
  0x28   :  { %v914_v1 = vld [vmem:[#allocation10 + $0x38] sm:$0xff]  ;;  %219 = vmatpush.bf16.msra.mxu0 %v903_v0  ;;  %243 = vmatpush.bf16.msra.mxu1 %v903_v0  ;;  %v913_v4 = vld [vmem:[#allocation10 + $0x30] sm:$0xff]  ;;  %v904_v7 = vld [vmem:[#allocation5] sm:$0xff]  ;;  %s683_s18 = sshll.u32 %s1259_s15, 4  ;;  %s1260_s20 = smov [#allocation18]   ;;  %s684_s18 = int_to_ptr.vmem [resolvable:$true] %s683_s18 }
  0x29   :  { %v922_v3 = vld [vmem:[#allocation11 + $0x38] sm:$0xff]  ;;  %402 = vmatpush.bf16.msra.mxu3 %v914_v1  ;;  %v921_v6 = vld [vmem:[#allocation11 + $0x30] sm:$0xff]  ;;  %v905_v8 = vld [vmem:[#allocation7] sm:$0xff]  ;;  %s696_s21 = sshll.u32 %s1260_s20, 4  ;;  %s698_s3 = sshll.u32 %s1418_s13, 4  ;;  %s697_s21 = int_to_ptr.vmem [resolvable:$true] %s696_s21  ;;  %s699_s3 = int_to_ptr.hbm [resolvable:$true] %s698_s3 }
  0x2a   :  { %v930_v5 = vld [vmem:[#allocation13 + $0x38] sm:$0xff]  ;;  %334 = vmatpush.bf16.msra.mxu2 %v922_v3  ;;  %v912_v9 = vld [vmem:[#allocation10 + $0x28] sm:$0xff]  ;;  %v929_v10 = vld [vmem:[#allocation13 + $0x30] sm:$0xff]  ;;  %s1262_s22 = smov 8  }
  0x2b   :  { %v920_v11 = vld [vmem:[#allocation11 + $0x28] sm:$0xff]  ;;  %v911_v12 = vld [vmem:[#allocation10 + $0x20] sm:$0xff]  ;;  %v910_v15 = vld [vmem:[#allocation10 + $0x18] sm:$0xff] }
  0x2c   :  { %220 = vmatpush.bf16.msra.mxu0 %v902_v2  ;;  %244 = vmatpush.bf16.msra.mxu1 %v902_v2  ;;  %v928_v13 = vld [vmem:[#allocation13 + $0x28] sm:$0xff]  ;;  %v919_v14 = vld [vmem:[#allocation11 + $0x20] sm:$0xff]  ;;  %v918_v17 = vld [vmem:[#allocation11 + $0x18] sm:$0xff] }
  0x2d   :  { %403 = vmatpush.bf16.msra.mxu3 %v913_v4  ;;  %v927_v16 = vld [vmem:[#allocation13 + $0x20] sm:$0xff]  ;;  %v909_v18 = vld [vmem:[#allocation10 + $0x10] sm:$0xff]  ;;  %v926_v19 = vld [vmem:[#allocation13 + $0x18] sm:$0xff] }
  0x2e   :  { %335 = vmatpush.bf16.msra.mxu2 %v921_v6  ;;  %v908_v20 = vld [vmem:[#allocation10 + $0x8] sm:$0xff]  ;;  %v917_v21 = vld [vmem:[#allocation11 + $0x10] sm:$0xff]  ;;  %v907_v22 = vld [vmem:[#allocation10] sm:$0xff] }
  0x2f   :  { %732 = vmatmul.msk.bf16.vlgmr.msra.gmra.mxu0 %vm209_vm0, %v904_v7  ;;  %737 = vmatmul.msk.bf16.vlgmr.msra.gmra.mxu1 %vm209_vm0, %v905_v8  ;;  %v925_v23 = vld [vmem:[#allocation13 + $0x10] sm:$0xff]  ;;  %v906_v24 = vld [vmem:[#allocation2] sm:$0xff]  ;;  %v916_v25 = vld [vmem:[#allocation11 + $0x8] sm:$0xff] }
  0x30   :  { %481 = vmatpush.bf16.msrb.mxu0 %v930_v5  ;;  %v924_v26 = vld [vmem:[#allocation13 + $0x8] sm:$0xff]  ;;  %v915_v27 = vld [vmem:[#allocation11] sm:$0xff]  ;;  %v938_v29 = vld [vmem:[#allocation14 + $0x38] sm:$0xff] }
  0x31   :  { %404 = vmatpush.bf16.msra.mxu3 %v912_v9  ;;  %v923_v28 = vld [vmem:[#allocation13] sm:$0xff]  ;;  %574 = vmatpush.bf16.msrb.mxu1 %v938_v29  ;;  %v937_v36 = vld [vmem:[#allocation14 + $0x30] sm:$0xff]  ;;  %v936_v37 = vld [vmem:[#allocation14 + $0x28] sm:$0xff] }
  0x32   :  { %336 = vmatpush.bf16.msra.mxu2 %v920_v11  ;;  %v935_v38 = vld [vmem:[#allocation14 + $0x20] sm:$0xff]  ;;  %v934_v39 = vld [vmem:[#allocation14 + $0x18] sm:$0xff]  ;;  %v933_v40 = vld [vmem:[#allocation14 + $0x10] sm:$0xff] }
  0x33   :  { %v932_v41 = vld [vmem:[#allocation14 + $0x8] sm:$0xff]  ;;  %v931_v42 = vld [vmem:[#allocation14] sm:$0xff]  ;;  %v946_v43 = vld [vmem:[#allocation16 + $0x38] sm:$0xff] }
  0x34   :  { %482 = vmatpush.bf16.msrb.mxu0 %v929_v10  ;;  %v945_v44 = vld [vmem:[#allocation16 + $0x30] sm:$0xff]  ;;  %v944_v45 = vld [vmem:[#allocation16 + $0x28] sm:$0xff]  ;;  %v943_v46 = vld [vmem:[#allocation16 + $0x20] sm:$0xff] }
  0x35   :  { %405 = vmatpush.bf16.msra.mxu3 %v911_v12  ;;  %575 = vmatpush.bf16.msrb.mxu1 %v937_v36  ;;  %v967_v52 = vld [vmem:[%s1412_s7] ss:$0 sm:$0xff]  ;;  %v941_v0 = vld [vmem:[#allocation16 + $0x10] sm:$0xff]  ;;  %v940_v1 = vld [vmem:[#allocation16 + $0x8] sm:$0xff] }
  0x36   :  { %337 = vmatpush.bf16.msra.mxu2 %v919_v14  ;;  %v942_v63 = vld [vmem:[#allocation16 + $0x18] sm:$0xff]  ;;  %v939_v2 = vld [vmem:[#allocation16] sm:$0xff] }
  0x37   :  { %v968_v4 = vld [vmem:[%s1414_s9] ss:$0 sm:$0xff]  ;;  %s685_s9 = sshll.u32 %s1417_s12, 4  ;;  %s686_s9 = int_to_ptr.hbm [resolvable:$true] %s685_s9 }
  0x38   :  { %483 = vmatpush.bf16.msrb.mxu0 %v928_v13  ;;  %v969_v11 = vld [vmem:[%s1416_s11] ss:$0 sm:$0xff]  ;;  %s1261_s11 = smov 128  }
  0x39   :  { %406 = vmatpush.bf16.msra.mxu3 %v910_v15  ;;  %576 = vmatpush.bf16.msrb.mxu1 %v936_v37 }
  0x3a   :  { %338 = vmatpush.bf16.msra.mxu2 %v918_v17 }
  0x3c   :  { %484 = vmatpush.bf16.msrb.mxu0 %v927_v16 }
  0x3d   :  { %407 = vmatpush.bf16.msra.mxu3 %v909_v18  ;;  %577 = vmatpush.bf16.msrb.mxu1 %v935_v38 }
  0x3e   :  { %339 = vmatpush.bf16.msra.mxu2 %v917_v21 }
  0x40   :  { %485 = vmatpush.bf16.msrb.mxu0 %v926_v19 }
  0x41   :  { %408 = vmatpush.bf16.msra.mxu3 %v908_v20  ;;  %578 = vmatpush.bf16.msrb.mxu1 %v934_v39 }
  0x42   :  { %340 = vmatpush.bf16.msra.mxu2 %v916_v25 }
  0x44   :  { %486 = vmatpush.bf16.msrb.mxu0 %v925_v23 }
  0x45   :  { %409 = vmatpush.bf16.msra.mxu3 %v907_v22  ;;  %579 = vmatpush.bf16.msrb.mxu1 %v933_v40 }
  0x46   :  { %341 = vmatpush.bf16.msra.mxu2 %v915_v27 }
  0x48   :  { %410 = vmatmul.bf16.vlgmr.msra.gmra.mxu3 %v906_v24  ;;  %487 = vmatpush.bf16.msrb.mxu0 %v924_v26 }
  0x49   :  { %580 = vmatpush.bf16.msrb.mxu1 %v932_v41 }
  0x4a   :  { %659 = vmatpush.bf16.msrb.mxu2 %v946_v43 }
  0x4c   :  { %488 = vmatpush.bf16.msrb.mxu0 %v923_v28 }
  0x4d   :  { %581 = vmatpush.bf16.msrb.mxu1 %v931_v42 }
  0x4e   :  { %660 = vmatpush.bf16.msrb.mxu2 %v945_v44 }
  0x52   :  { %661 = vmatpush.bf16.msrb.mxu2 %v944_v45 }
  0x56   :  { %662 = vmatpush.bf16.msrb.mxu2 %v943_v46 }
  0x5a   :  { %663 = vmatpush.bf16.msrb.mxu2 %v942_v63 }
  0x5e   :  { %664 = vmatpush.bf16.msrb.mxu2 %v941_v0 }
  0x62   :  { %665 = vmatpush.bf16.msrb.mxu2 %v940_v1 }
  0x66   :  { %666 = vmatpush.bf16.msrb.mxu2 %v939_v2 }
  0xac   :  { %v222_v30 = vpop.f32.mrf.mxu0  ;;  %v246_v31 = vpop.f32.mrf.mxu1 }
  0xb4   :  { %v224_v32 = vpop.f32.mrf.mxu0  ;;  %v248_v33 = vpop.f32.mrf.mxu1 }
  0xb5   :  { %v416_v34 = vpack.c.bf16 %v224_v32, %v222_v30  ;;  %v269_v35 = vpack.c.bf16 %v248_v33, %v246_v31 }
  0xb7   :  { %342 = vmatmul.bf16.vlgmr.msra.gmra.mxu2 %v269_v35  ;;  %489 = vmatmul.bf16.vlgmr.msrb.gmra.mxu0 %v416_v34 }
  0xcb   :  { %v411_v47 = vpop.f32.mrf.mxu3 }
  0xd3   :  { %v413_v53 = vpop.f32.mrf.mxu3 }
 0x134   :  { %v490_v48 = vpop.f32.mrf.mxu0 }
 0x13a   :  { %v343_v49 = vpop.f32.mrf.mxu2 }
 0x13b   :  { %v412_v50 = vadd.f32 %v411_v47, %v343_v49 }
 0x13c   :  { %v492_v56 = vpop.f32.mrf.mxu0 }
 0x13d   :  { %v495_v51 = vadd.f32 %v490_v48, %v412_v50 }
 0x13f   :  { %v501_v57 = vadd.f32 %v967_v52, %v495_v51 }
 0x141   :  { %v503_v60 = vmax.f32 %v501_v57, 0.0 }
 0x142   :  { %v345_v54 = vpop.f32.mrf.mxu2 }
 0x143   :  { %v414_v55 = vadd.f32 %v413_v53, %v345_v54 }
 0x145   :  { %v496_v58 = vadd.f32 %v492_v56, %v414_v55 }
 0x147   :  { %v502_v59 = vadd.f32 %v967_v52, %v496_v58 }
 0x149   :  { %v504_v61 = vmax.f32 %v502_v59, 0.0 }
 0x14b   :  { %v505_v62 = vpack.c.bf16 %v504_v61, %v503_v60 }
 0x14d   :  { %582 = vmatmul.bf16.vlgmr.msrb.gmra.mxu1 %v505_v62 }
 0x1ca   :  { %v583_v3 = vpop.f32.mrf.mxu1 }
 0x1cb   :  { %v584_v5 = vadd.f32 %v968_v4, %v583_v3 }
 0x1cd   :  { %v588_v8 = vmax.f32 %v584_v5, 0.0 }
 0x1d2   :  { %v585_v6 = vpop.f32.mrf.mxu1 }
 0x1d3   :  { %v586_v7 = vadd.f32 %v968_v4, %v585_v6 }
 0x1d5   :  { %v589_v9 = vmax.f32 %v586_v7, 0.0 }
 0x1d7   :  { %v590_v10 = vpack.c.bf16 %v589_v9, %v588_v8 }
 0x1d9   :  { %667 = vmatmul.bf16.vlgmr.msrb.gmra.mxu2 %v590_v10 }
 0x25c   :  { %v668_v12 = vpop.f32.mrf.mxu2 }
 0x25d   :  { %v669_v13 = vadd.f32 %v969_v11, %v668_v12 }
 0x25f   :  { %673 = vst [vmem:[#allocation17] sm:$0xff] %v669_v13 }
 0x264   :  { %v670_v14 = vpop.f32.mrf.mxu2 }
 0x265   :  { %v671_v15 = vadd.f32 %v969_v11, %v670_v14 }
 0x267   :  { %674 = vst [vmem:[#allocation17 + $0x8] sm:$0xff] %v671_v15  ;;  %v950_v16 = vpack.c.bf16 %v671_v15, %v669_v13 }
 0x268   :  { %691 = dma.vmem_to_hbm [thread:$0]  %s684_s18, 256, %s686_s9, [#allocation4], %s1261_s11, %s1261_s11, %s1262_s22  }
 0x269   :  { %951 = vst [vmem:[#allocation18] sm:$0xff] %v950_v16  }
 0x26a   :  { %704 = dma.vmem_to_hbm [thread:$0]  %s697_s21, 128, %s699_s3, [#allocation19], %s1249_s16, %s1249_s16, %s1250_s17  }
 0x26b   :  { %1244 = dma.done.wait [#allocation4], 256  }
 0x26c   :  { %1245 = vsyncadd [#allocation4], 4294967040 }
 0x26d   :  { %1246 = dma.done.wait [#allocation19], 128  }
 0x26e   :  { %1247 = vsyncadd [#allocation19], 4294967168 }
 0x26f   :  { %713 = vsyncpa [#allocation3], 1 }
 0x270   :  { %714 = vsyncpa [#allocation6], 1 }
 0x271   :  { %715 = vsyncpa [#allocation9], 1 }
 0x272   :  { %716 = vsyncpa [#allocation12], 1 }
 0x273   :  { %717 = vsyncpa [#allocation15], 1 }
 0x274   :  { %718 = vsyncpa [#allocation4], 1 }
 0x275   :  { %719 = vsyncpa [#allocation19], 1 }

</bundles_post_ra>
